<compile_context>
chip_gen: v7x
topology: tpu7x:2x2x1
jax: 0.10.0
libtpu: 0.0.40
codegen_flags: <defaults>
</compile_context>

<pallas_src>
import jax
import jax.numpy as jnp
from jax import lax
from jax.experimental import pallas as pl
from jax.experimental.pallas import tpu as pltpu

N = 128                # number of nodes
F_IN = 32              # input feature dim
H = 32                 # embedding dim
E = 128                # number of positive / negative edges
NNZ = 512              # number of sparse adjacency entries
NEG_SAMPLE_SIZE = 100  # matches reference; NCE_loss takes it but never uses it


def _log_sigmoid(x):
    # numerically-stable logsigmoid: min(x, 0) - log1p(exp(-|x|))
    return jnp.minimum(x, 0.0) - jnp.log1p(jnp.exp(-jnp.abs(x)))


# ---------------------------------------------------------------------------
# Fused kernel:
#   emb      = relu((A @ X) @ W)                              (MXU, f32 accumulate)
#   G_T      = emb^T-gather of ALL 4E endpoints in one matmul -> [H, 4E] lane-dense
#   score    = sum_H(G_T[:, :2E] * G_T[:, 2E:])               -> [1, 2E] lane-dense
#   loss     = sum(-logsig(score * sign)) / E                 -> SMEM (1, 1)
# ---------------------------------------------------------------------------
def _link_prediction_kernel(a_ref, x_ref, w_ref, idx_ref, o_ref):
    n_nodes = a_ref.shape[0]
    f_in = x_ref.shape[1]
    h_dim = w_ref.shape[1]
    n_idx = idx_ref.shape[1]          # 4E: [pos_src | neg_src | pos_dst | neg_dst]
    n_half = n_idx // 2               # 2E
    n_pos = n_idx // 4                # E

    # --- SimpleGCN layer. Contraction order chosen statically so the N^2-sized matmul
    #     uses the smaller of F_in / H as its output width (a wash when F_in == H).
    if h_dim < f_in:
        xw = jnp.dot(x_ref[...], w_ref[...], preferred_element_type=jnp.float32)
        emb = jnp.dot(a_ref[...], xw, preferred_element_type=jnp.float32)
    else:
        ax = jnp.dot(a_ref[...], x_ref[...], preferred_element_type=jnp.float32)
        emb = jnp.dot(ax, w_ref[...], preferred_element_type=jnp.float32)
    emb = jnp.maximum(emb, 0.0)                                          # [N, H], stays in VMEM

    # --- Single merged one-hot gather, edge axis lane-dense.
    #     onehot_T[n, e] = (n == idx[e])          -> [N, 4E]
    #     G_T[h, e]      = sum_n emb[n, h] * onehot_T[n, e]  (one MXU matmul, emb resident)
    node_iota = lax.broadcasted_iota(jnp.int32, (n_nodes, n_idx), 0)     # [N, 4E] (sublane iota)
    onehot_t = (node_iota == idx_ref[...]).astype(jnp.float32)           # [N, 4E]
    g_t = lax.dot_general(emb, onehot_t, (((0,), (0,)), ((), ())),
                          preferred_element_type=jnp.float32)            # [H, 4E]

    # Lane slices at a 128-multiple boundary (tile-aligned, no copy).
    g_src_t = g_t[:, :n_half]                                            # [H, 2E]
    g_dst_t = g_t[:, n_half:]                                            # [H, 2E]

    # score for all 2E edges as one lane-dense row (sublane-sum over H).
    score = jnp.sum(g_src_t * g_dst_t, axis=0, keepdims=True)            # [1, 2E]

    # NCE loss without pos/neg sub-slices: negate the negative-edge half via a +/-1 row,
    # one logsigmoid over all 2E scores, one sum * (1/E).
    lane = lax.broadcasted_iota(jnp.int32, (1, n_half), 1)               # [1, 2E]
    sign = jnp.where(lane < n_pos, 1.0, -1.0)
    loss_row = -_log_sigmoid(score * sign)                               # [1, 2E]

    o_ref[0, 0] = jnp.sum(loss_row) * (1.0 / n_pos)


# ---------------------------------------------------------------------------
# Wrapper = LinkPrediction.forward
# ---------------------------------------------------------------------------
@jax.jit
def link_prediction_forward(adj, feats, w, pos_edges, neg_edges):
    # Lane-major endpoint layout: one [1, 4E] int32 row = [pos_src | neg_src | pos_dst | neg_dst].
    # (Lane-dense indices -> lane-dense one-hot compare in-kernel; 4E is a multiple of 128.)
    idx = jnp.concatenate(
        [pos_edges[:, 0], neg_edges[:, 0], pos_edges[:, 1], neg_edges[:, 1]]
    ).astype(jnp.int32)[None, :]

    loss2d = pl.pallas_call(
        _link_prediction_kernel,
        out_shape=jax.ShapeDtypeStruct((1, 1), jnp.float32),
        in_specs=[
            pl.BlockSpec(memory_space=pltpu.MemorySpace.VMEM),   # adj   [N, N]
            pl.BlockSpec(memory_space=pltpu.MemorySpace.VMEM),   # feats [N, F_in]
            pl.BlockSpec(memory_space=pltpu.MemorySpace.VMEM),   # W     [F_in, H]
            pl.BlockSpec(memory_space=pltpu.MemorySpace.VMEM),   # idx   [1, 4E]
        ],
        out_specs=pl.BlockSpec(memory_space=pltpu.MemorySpace.SMEM),
    )(adj, feats, w, idx)
    return loss2d[0, 0]


# ---------------------------------------------------------------------------
# Pure-JAX reference for correctness check
# ---------------------------------------------------------------------------
def _reference(adj, feats, w, pos_edges, neg_edges):
    emb = jnp.maximum((adj @ feats) @ w, 0.0)

    def score(edges):
        return jnp.sum(emb[edges[:, 0]] * emb[edges[:, 1]], axis=1)

    ps, ns = score(pos_edges), score(neg_edges)
    return jnp.mean(-jax.nn.log_sigmoid(ps) - jax.nn.log_sigmoid(-ns))


if __name__ == "__main__":
    key = jax.random.PRNGKey(0)
    k_idx, k_val, k_feat, k_w, k_pos, k_neg = jax.random.split(key, 6)

    # deterministic synthetic sparse adjacency (non_zero_index / non_zero_value)
    non_zero_index = jax.random.randint(k_idx, (NNZ, 2), 0, N, dtype=jnp.int32)
    non_zero_value = jax.random.uniform(k_val, (NNZ,), dtype=jnp.float32)
    adj = jnp.zeros((N, N), jnp.float32).at[
        non_zero_index[:, 0], non_zero_index[:, 1]
    ].add(non_zero_value)
    # simple row normalization (SimpleGCN-style propagation matrix)
    adj = adj / jnp.maximum(adj.sum(axis=1, keepdims=True), 1e-6)

    features = jax.random.normal(k_feat, (N, F_IN), dtype=jnp.float32)
    weight = 0.1 * jax.random.normal(k_w, (F_IN, H), dtype=jnp.float32)

    positive_edges = jax.random.randint(k_pos, (E, 2), 0, N, dtype=jnp.int32)
    negative_edges = jax.random.randint(k_neg, (E, 2), 0, N, dtype=jnp.int32)

    loss = link_prediction_forward(adj, features, weight, positive_edges, negative_edges)
    loss = jax.block_until_ready(loss)

    ref = _reference(adj, features, weight, positive_edges, negative_edges)
    assert jnp.allclose(loss, ref, rtol=1e-5, atol=1e-5), (loss, ref)

    print("KERNEL_OK")
</pallas_src>

<mosaic_0001>
module attributes {stable_mosaic.version = 11 : i64} {
  func.func @_link_prediction_kernel(%arg0: memref<128x128xf32, #tpu.memory_space<vmem>>, %arg1: memref<128x32xf32, #tpu.memory_space<vmem>>, %arg2: memref<32x32xf32, #tpu.memory_space<vmem>>, %arg3: memref<1x512xi32, #tpu.memory_space<vmem>>, %arg4: memref<1x1xf32, #tpu.memory_space<smem>>) attributes {dimension_semantics = [], scalar_prefetch = 0 : i64, scratch_operands = 0 : i64, tpu.core_type = #tpu.core_type<tc>} {
    %c0 = arith.constant 0 : index
    %c0_0 = arith.constant 0 : index
    %0 = vector.load %arg0[%c0, %c0_0] : memref<128x128xf32, #tpu.memory_space<vmem>>, vector<128x128xf32>
    %c0_1 = arith.constant 0 : index
    %c0_2 = arith.constant 0 : index
    %1 = vector.load %arg1[%c0_1, %c0_2] : memref<128x32xf32, #tpu.memory_space<vmem>>, vector<128x32xf32>
    %cst = arith.constant dense<0.000000e+00> : vector<128x32xf32>
    %2 = tpu.matmul %0, %1, %cst {dimension_numbers = #tpu.dot_dimension_numbers<[1], [0], [0], [1], [0, 0, 1, 1], [], []>} : vector<128x128xf32>, vector<128x32xf32>, vector<128x32xf32> -> vector<128x32xf32>
    %c0_3 = arith.constant 0 : index
    %c0_4 = arith.constant 0 : index
    %3 = vector.load %arg2[%c0_3, %c0_4] : memref<32x32xf32, #tpu.memory_space<vmem>>, vector<32x32xf32>
    %cst_5 = arith.constant dense<0.000000e+00> : vector<128x32xf32>
    %4 = tpu.matmul %2, %3, %cst_5 {dimension_numbers = #tpu.dot_dimension_numbers<[1], [0], [0], [1], [0, 0, 1, 1], [], []>} : vector<128x32xf32>, vector<32x32xf32>, vector<128x32xf32> -> vector<128x32xf32>
    %cst_6 = arith.constant 0.000000e+00 : f32
    %5 = vector.broadcast %cst_6 : f32 to vector<128x32xf32>
    %6 = arith.maximumf %4, %5 : vector<128x32xf32>
    %7 = tpu.iota {dimensions = array<i32: 0>} : vector<128x512xi32>
    %c0_7 = arith.constant 0 : index
    %c0_8 = arith.constant 0 : index
    %8 = vector.load %arg3[%c0_7, %c0_8] : memref<1x512xi32, #tpu.memory_space<vmem>>, vector<1x512xi32>
    %9 = vector.broadcast %8 : vector<1x512xi32> to vector<128x512xi32>
    %10 = arith.cmpi eq, %7, %9 : vector<128x512xi32>
    %11 = arith.extui %10 : vector<128x512xi1> to vector<128x512xi32>
    %12 = arith.sitofp %11 : vector<128x512xi32> to vector<128x512xf32>
    %cst_9 = arith.constant dense<0.000000e+00> : vector<32x512xf32>
    %13 = tpu.matmul %6, %12, %cst_9 {dimension_numbers = #tpu.dot_dimension_numbers<[0], [0], [1], [1], [0, 1, 1, 1], [], []>} : vector<128x32xf32>, vector<128x512xf32>, vector<32x512xf32> -> vector<32x512xf32>
    %14 = vector.extract_strided_slice %13 {offsets = [0, 0], sizes = [32, 256], strides = [1, 1]} : vector<32x512xf32> to vector<32x256xf32>
    %15 = vector.extract_strided_slice %13 {offsets = [0, 256], sizes = [32, 256], strides = [1, 1]} : vector<32x512xf32> to vector<32x256xf32>
    %16 = arith.mulf %14, %15 : vector<32x256xf32>
    %cst_10 = arith.constant dense<0.000000e+00> : vector<256xf32>
    %17 = vector.multi_reduction <add>, %16, %cst_10 [0] : vector<32x256xf32> to vector<256xf32>
    %18 = vector.shape_cast %17 : vector<256xf32> to vector<1x256xf32>
    %19 = tpu.iota {dimensions = array<i32: 1>} : vector<1x256xi32>
    %c128_i32 = arith.constant 128 : i32
    %20 = vector.broadcast %c128_i32 : i32 to vector<1x256xi32>
    %21 = arith.cmpi slt, %19, %20 : vector<1x256xi32>
    %cst_11 = arith.constant 1.000000e+00 : f32
    %cst_12 = arith.constant -1.000000e+00 : f32
    %22 = vector.broadcast %cst_11 : f32 to vector<1x256xf32>
    %23 = vector.broadcast %cst_12 : f32 to vector<1x256xf32>
    %24 = arith.select %21, %22, %23 : vector<1x256xi1>, vector<1x256xf32>
    %25 = arith.mulf %18, %24 : vector<1x256xf32>
    %cst_13 = arith.constant 0.000000e+00 : f32
    %26 = vector.broadcast %cst_13 : f32 to vector<1x256xf32>
    %27 = arith.minimumf %25, %26 : vector<1x256xf32>
    %28 = math.absf %25 : vector<1x256xf32>
    %cst_14 = arith.constant 0.000000e+00 : f32
    %29 = vector.broadcast %cst_14 : f32 to vector<1x256xf32>
    %30 = arith.subf %29, %28 : vector<1x256xf32>
    %31 = math.exp %30 : vector<1x256xf32>
    %32 = math.log1p %31 : vector<1x256xf32>
    %33 = arith.subf %27, %32 : vector<1x256xf32>
    %cst_15 = arith.constant 0.000000e+00 : f32
    %34 = vector.broadcast %cst_15 : f32 to vector<1x256xf32>
    %35 = arith.subf %34, %33 : vector<1x256xf32>
    %36 = vector.shape_cast %35 : vector<1x256xf32> to vector<1x1x256xf32>
    %cst_16 = arith.constant dense<0.000000e+00> : vector<1xf32>
    %37 = vector.multi_reduction <add>, %36, %cst_16 [1, 2] : vector<1x1x256xf32> to vector<1xf32>
    %38 = vector.shape_cast %37 : vector<1xf32> to vector<1x1x1xf32>
    %39 = vector.extract %38[0, 0, 0] : f32 from vector<1x1x1xf32>
    %cst_17 = arith.constant 7.812500e-03 : f32
    %40 = arith.mulf %39, %cst_17 : f32
    %c0_18 = arith.constant 0 : index
    %c0_19 = arith.constant 0 : index
    %41 = memref.load %arg4[%c0_18, %c0_19] : memref<1x1xf32, #tpu.memory_space<smem>>
    memref.store %40, %arg4[%c0_18, %c0_19] : memref<1x1xf32, #tpu.memory_space<smem>>
    return
  }
}

</mosaic_0001>

<bundles_post_ra>
// kernel: link_prediction_forward.1
= control target key start
LH: loop header
LB: loop body
LE: loop exit
PB: predicated region body
PF: predicated region fallthrough
CT: control target
= control target key end

     0   :  { %s1818_s0 = inlined_call_operand.vmem [shape: f32[128,128], index: 0, kind: input, shape index: {}]   ;;  %s1819_s1 = inlined_call_operand.vmem [shape: f32[128,32], index: 1, kind: input, shape index: {}]   ;;  %s1820_s2 = inlined_call_operand.vmem [shape: f32[32,32], index: 2, kind: input, shape index: {}]   ;;  %s1821_s3 = inlined_call_operand.vmem [shape: s32[1,512], index: 3, kind: input, shape index: {}]   ;;  %s1822_s4 = inlined_call_operand.hbm [shape: f32[1,1], index: 4, kind: output, shape index: {}]  }
   0x1   :  { %v34_v0 = vld [vmem:[%s1819_s1] sm:$0xff]  ;;  %v35_v1 = vld [vmem:[%s1819_s1 + $0x8] sm:$0xff]  ;;  %v36_v2 = vld [vmem:[%s1819_s1 + $0x10] sm:$0xff] }
   0x2   :  { %v1225_v3 = vpack.c.bf16 %v35_v1, %v34_v0  ;;  %v37_v4 = vld [vmem:[%s1819_s1 + $0x18] sm:$0xff]  ;;  %v38_v6 = vld [vmem:[%s1819_s1 + $0x20] sm:$0xff]  ;;  %v39_v7 = vld [vmem:[%s1819_s1 + $0x28] sm:$0xff] }
   0x3   :  { %v1229_v5 = vpack.c.bf16 %v37_v4, %v36_v2  ;;  %v1233_v8 = vpack.c.bf16 %v39_v7, %v38_v6  ;;  %v18_v9 = vld [vmem:[%s1818_s0] sm:$0xff]  ;;  %v40_v10 = vld [vmem:[%s1819_s1 + $0x30] sm:$0xff]  ;;  %v41_v11 = vld [vmem:[%s1819_s1 + $0x38] sm:$0xff] }
   0x4   :  { %1226 = vmatprep.subr.bf16.mxu0 %v1225_v3  ;;  %1169 = vmatprep.mubr.f32.mxu0 %v18_v9  ;;  %v1237_v12 = vpack.c.bf16 %v41_v11, %v40_v10  ;;  %v42_v13 = vld [vmem:[%s1819_s1 + $0x40] sm:$0xff]  ;;  %v43_v14 = vld [vmem:[%s1819_s1 + $0x48] sm:$0xff]  ;;  %v197_v17 = vld [vmem:[%s1820_s2 + $0x10] sm:$0xff] }
   0x5   :  { %1228 = vmatpush3.bf16.msra.mxu0 %v1225_v3  ;;  %v195_v15 = vld [vmem:[%s1820_s2] sm:$0xff]  ;;  %v196_v16 = vld [vmem:[%s1820_s2 + $0x8] sm:$0xff]  ;;  %v198_v18 = vld [vmem:[%s1820_s2 + $0x18] sm:$0xff] }
   0x6   :  { %1230 = vmatprep.subr.bf16.mxu0 %v1229_v5  ;;  %v1257_v19 = vpack.c.bf16 %v196_v16, %v195_v15  ;;  %v1261_v20 = vpack.c.bf16 %v198_v18, %v197_v17 }
   0x9   :  { %1232 = vmatpush3.bf16.msra.mxu0 %v1229_v5 }
   0xa   :  { %1234 = vmatprep.subr.bf16.mxu0 %v1233_v8 }
   0xd   :  { %1236 = vmatpush3.bf16.msra.mxu0 %v1233_v8 }
   0xe   :  { %9 = vsyncpa [#allocation3], 0  ;;  %1238 = vmatprep.subr.bf16.mxu0 %v1237_v12  ;;  %v1241_v21 = vpack.c.bf16 %v43_v14, %v42_v13  ;;  %v44_v22 = vld [vmem:[%s1819_s1 + $0x50] sm:$0xff]  ;;  %v45_v23 = vld [vmem:[%s1819_s1 + $0x58] sm:$0xff]  ;;  %1258 = vmatprep.subr.bf16.mxu1 %v1257_v19  ;;  %vm199_vm0 = vcmask 261120   ;;  %v409_v62 = vlaneseq  ;;  %v1370_v63 = vmov 0.0  }
   0xf   :  { %1260 = vmatpush3.bf16.msra.mxu1 %v1257_v19  ;;  %v1245_v24 = vpack.c.bf16 %v45_v23, %v44_v22  ;;  %v46_v25 = vld [vmem:[%s1819_s1 + $0x60] sm:$0xff]  ;;  %v47_v26 = vld [vmem:[%s1819_s1 + $0x68] sm:$0xff]  ;;  %v48_v28 = vld [vmem:[%s1819_s1 + $0x70] sm:$0xff]  ;;  %v1371_v13 = vmov 1.0|1.0  }
  0x10   :  { %1262 = vmatprep.subr.bf16.mxu1 %v1261_v20  ;;  %v1249_v27 = vpack.c.bf16 %v47_v26, %v46_v25  ;;  %v49_v29 = vld [vmem:[%s1819_s1 + $0x78] sm:$0xff]  ;;  %v19_v31 = vld [vmem:[%s1818_s0 + $0x8] sm:$0xff]  ;;  %v20_v32 = vld [vmem:[%s1818_s0 + $0x10] sm:$0xff]  ;;  %v1524_v0 = vshrl.u32 %v409_v62, 7  ;;  %v1843_v25 = vmov 0  ;;  %s1358_s1 = scalar_lea.hbm %s1822_s4, 16 }
  0x11   :  { %1240 = vmatpush3.bf16.msra.mxu0 %v1237_v12  ;;  %v1253_v30 = vpack.c.bf16 %v49_v29, %v48_v28  ;;  %v21_v33 = vld [vmem:[%s1818_s0 + $0x18] sm:$0xff]  ;;  %v22_v34 = vld [vmem:[%s1818_s0 + $0x20] sm:$0xff]  ;;  %v23_v35 = vld [vmem:[%s1818_s0 + $0x28] sm:$0xff]  ;;  %v1845_v28 = vmov 0  ;;  %v1847_v29 = vmov 0  ;;  %p1359_p0 = scmp.ne.s32.totalorder %s1822_s4, %s1358_s1  ;;  %p1362_p1 = scmp.lt.u32.totalorder %s1358_s1, %s1822_s4 }
  0x12   :  { %1242 = vmatprep.subr.bf16.mxu0 %v1241_v21  ;;  %v24_v36 = vld [vmem:[%s1818_s0 + $0x30] sm:$0xff]  ;;  %v25_v37 = vld [vmem:[%s1818_s0 + $0x38] sm:$0xff]  ;;  %v26_v38 = vld [vmem:[%s1818_s0 + $0x40] sm:$0xff]  ;;  %v411_v2 = vadd.s32 8, %v1524_v0  ;;  %v433_v3 = vsub.s32 1, %v1524_v0  ;;  %v429_v4 = vsub.s32 0, %v1524_v0 }
  0x13   :  { %1264 = vmatpush3.bf16.msra.mxu1 %v1261_v20  ;;  %v27_v39 = vld [vmem:[%s1818_s0 + $0x48] sm:$0xff]  ;;  %v28_v40 = vld [vmem:[%s1818_s0 + $0x50] sm:$0xff]  ;;  %v29_v41 = vld [vmem:[%s1818_s0 + $0x58] sm:$0xff]  ;;  %v441_v5 = vsub.s32 3, %v1524_v0  ;;  %v437_v6 = vsub.s32 2, %v1524_v0  ;;  %v412_v7 = vadd.s32 16, %v1524_v0  ;;  %p1364_p2 = pnand %p1362_p1, %p1359_p0 }
  0x14   :  { %v30_v42 = vld [vmem:[%s1818_s0 + $0x60] sm:$0xff]  ;;  %v31_v43 = vld [vmem:[%s1818_s0 + $0x68] sm:$0xff]  ;;  %v32_v44 = vld [vmem:[%s1818_s0 + $0x70] sm:$0xff]  ;;  %v413_v11 = vadd.s32 24, %v1524_v0  ;;  %v414_v14 = vadd.s32 32, %v1524_v0  ;;  %v415_v15 = vadd.s32 40, %v1524_v0 }
  0x15   :  { %1244 = vmatpush3.bf16.msra.mxu0 %v1241_v21  ;;  %v33_v45 = vld [vmem:[%s1818_s0 + $0x78] sm:$0xff]  ;;  %v426_v1 = vld [vmem:[%s1821_s3] sm:$0xf]  ;;  %v416_v18 = vadd.s32 48, %v1524_v0  ;;  %v417_v19 = vadd.s32 56, %v1524_v0  ;;  %v1837_v20 = vmov 0 }
  0x16   :  { %1246 = vmatprep.subr.bf16.mxu0 %v1245_v24  ;;  %v1535_v8 = vrot.slane %v426_v1, %v433_v3  ;;  %v1537_v9 = vrot.slane %v426_v1, %v429_v4  ;;  %v1539_v10 = vrot.slane %v426_v1, %v441_v5  ;;  %v1542_v12 = vrot.slane %v426_v1, %v437_v6 }
  0x17   :  { %v1839_v21 = vmov 0  ;;  %v418_v22 = vadd.s32 64, %v1524_v0  ;;  %v419_v23 = vadd.s32 72, %v1524_v0  ;;  %v420_v26 = vadd.s32 80, %v1524_v0 }
  0x18   :  { %vm444_vm1 = vcmp.eq.s32.totalorder %v1524_v0, %v1535_v8  ;;  %vm448_vm2 = vcmp.eq.s32.totalorder %v411_v2, %v1535_v8  ;;  %vm443_vm3 = vcmp.eq.s32.totalorder %v1524_v0, %v1537_v9  ;;  %vm447_vm4 = vcmp.eq.s32.totalorder %v411_v2, %v1537_v9 }
  0x19   :  { %1248 = vmatpush3.bf16.msra.mxu0 %v1245_v24  ;;  %vm1265_vm5 = vmpackc.low %vm448_vm2, %vm444_vm1  ;;  %vm446_vm6 = vcmp.eq.s32.totalorder %v1524_v0, %v1539_v10  ;;  %vm450_vm7 = vcmp.eq.s32.totalorder %v411_v2, %v1539_v10  ;;  %vm445_vm8 = vcmp.eq.s32.totalorder %v1524_v0, %v1542_v12  ;;  %vm449_vm9 = vcmp.eq.s32.totalorder %v411_v2, %v1542_v12 }
  0x1a   :  { %1250 = vmatprep.subr.bf16.mxu0 %v1249_v27  ;;  %1266 = vmatprep.subr.msk.bf16.mxu1 %vm1265_vm5, %v1371_v13  ;;  %vm1267_vm10 = vmpackc.low %vm447_vm4, %vm443_vm3  ;;  %vm452_vm11 = vcmp.eq.s32.totalorder %v412_v7, %v1535_v8  ;;  %vm456_vm12 = vcmp.eq.s32.totalorder %v413_v11, %v1535_v8  ;;  %vm451_vm14 = vcmp.eq.s32.totalorder %v412_v7, %v1537_v9  ;;  %v1841_v24 = vmov 0 }
  0x1b   :  { %vm1562_vm13 = vmpackc.low %vm450_vm7, %vm446_vm6  ;;  %vm455_vm15 = vcmp.eq.s32.totalorder %v413_v11, %v1537_v9  ;;  %vm454_vm1 = vcmp.eq.s32.totalorder %v412_v7, %v1539_v10  ;;  %vm458_vm2 = vcmp.eq.s32.totalorder %v413_v11, %v1539_v10  ;;  %vm453_vm4 = vcmp.eq.s32.totalorder %v412_v7, %v1542_v12 }
  0x1c   :  { %vm1269_vm3 = vmpackc.low %vm456_vm12, %vm452_vm11  ;;  %vm457_vm5 = vcmp.eq.s32.totalorder %v413_v11, %v1542_v12  ;;  %vm460_vm7 = vcmp.eq.s32.totalorder %v414_v14, %v1535_v8  ;;  %vm463_vm11 = vcmp.eq.s32.totalorder %v415_v15, %v1537_v9 }
  0x1d   :  { %1252 = vmatpush3.bf16.msra.mxu0 %v1249_v27  ;;  %vm1271_vm6 = vmpackc.low %vm455_vm15, %vm451_vm14  ;;  %vm462_vm14 = vcmp.eq.s32.totalorder %v414_v14, %v1539_v10  ;;  %vm466_vm15 = vcmp.eq.s32.totalorder %v415_v15, %v1539_v10  ;;  %v421_v27 = vadd.s32 88, %v1524_v0 }
  0x1e   :  { %1254 = vmatprep.subr.bf16.mxu0 %v1253_v30  ;;  %vm1597_vm12 = vmpackc.low %vm457_vm5, %vm453_vm4  ;;  %vm468_vm4 = vcmp.eq.s32.totalorder %v416_v18, %v1535_v8  ;;  %vm472_vm5 = vcmp.eq.s32.totalorder %v417_v19, %v1535_v8 }
  0x1f   :  { %v1840_v21 = vsel %vm1597_vm12, 4294967295, %v1839_v21 }
  0x21   :  { %1256 = vmatpush3.bf16.msra.mxu0 %v1253_v30  ;;  %v422_v30 = vadd.s32 96, %v1524_v0 }
  0x22   :  { %1298 = vmatprep.subr.msk.bf16.mxu0 %vm1562_vm13, %v1371_v13 }
  0x24   :  { %1170 = vmatmul.mubr.f32.vlgmr.msra.gmra.mrb[0].mxu0 %v19_v31  ;;  %v423_v31 = vadd.s32 104, %v1524_v0 }
  0x25   :  { %1172 = vmatprep.mubr.f32.mxu0 %v20_v32  ;;  %v1849_v32 = vmov 0 }
  0x28   :  { %1173 = vmatmul.mubr.f32.gmra.mrb[2].mxu0 %v21_v33  ;;  %v1851_v33 = vmov 0 }
  0x29   :  { %1175 = vmatprep.mubr.f32.mxu0 %v22_v34  ;;  %v424_v34 = vadd.s32 112, %v1524_v0 }
  0x2c   :  { %1176 = vmatmul.mubr.f32.gmra.mrb[4].mxu0 %v23_v35  ;;  %v425_v35 = vadd.s32 120, %v1524_v0 }
  0x2d   :  { %1178 = vmatprep.mubr.f32.mxu0 %v24_v36  ;;  %v1853_v36 = vmov 0 }
  0x30   :  { %1179 = vmatmul.mubr.f32.gmra.mrb[6].mxu0 %v25_v37  ;;  %v1855_v37 = vmov 0 }
  0x31   :  { %1181 = vmatprep.mubr.f32.mxu0 %v26_v38 }
  0x34   :  { %1182 = vmatmul.mubr.f32.gmra.mrb[8].mxu0 %v27_v39 }
  0x35   :  { %1184 = vmatprep.mubr.f32.mxu0 %v28_v40 }
  0x38   :  { %1185 = vmatmul.mubr.f32.gmra.mrb[10].mxu0 %v29_v41 }
  0x39   :  { %1187 = vmatprep.mubr.f32.mxu0 %v30_v42 }
  0x3c   :  { %1188 = vmatmul.mubr.f32.gmra.mrb[12].mxu0 %v31_v43 }
  0x3d   :  { %1190 = vmatprep.mubr.f32.mxu0 %v32_v44 }
  0x40   :  { %1191 = vmatmul.mubr.f32.gmra.mrb[14].mxu0 %v33_v45 }
  0x41   :  { %820 = vmatprep.mubr.f32.mxu0 %v1370_v63 }
  0xf7   :  { %v1171_v46 = vpop.f32.mrb[0].mxu0 }
  0xf8   :  { %v116_v47 = vpop.f32.mrb[1].mxu0 }
  0xf9   :  { %1201 = vmatprep.mubr.msk.f32.mxu1 %vm199_vm0, %v116_v47 }
  0xfa   :  { %1202 = vmatmul.mubr.msk.f32.vlgmr.msra.gmra.mrb[0].mxu1 %vm199_vm0, %v1171_v46 }
  0xfb   :  { %v1174_v48 = vpop.f32.mrb[2].mxu0  ;;  %1268 = vmatpush1.bf16.msk.msra.mxu1 %vm1267_vm10, %v1371_v13  ;;  %vm459_vm10 = vcmp.eq.s32.totalorder %v414_v14, %v1537_v9 }
  0xfc   :  { %v126_v49 = vpop.f32.mrb[3].mxu0  ;;  %1270 = vmatprep.subr.msk.bf16.mxu1 %vm1269_vm3, %v1371_v13  ;;  %vm465_vm3 = vcmp.eq.s32.totalorder %v415_v15, %v1542_v12 }
  0xfd   :  { %1204 = vmatprep.mubr.msk.f32.mxu1 %vm199_vm0, %v126_v49 }
  0xfe   :  { %1205 = vmatmul.mubr.msk.f32.gmra.mrb[2].mxu1 %vm199_vm0, %v1174_v48 }
  0xff   :  { %v1177_v50 = vpop.f32.mrb[4].mxu0  ;;  %1272 = vmatpush1.bf16.msk.msra.mxu1 %vm1271_vm6, %v1371_v13  ;;  %vm1275_vm6 = vmpackc.low %vm463_vm11, %vm459_vm10  ;;  %vm470_vm11 = vcmp.eq.s32.totalorder %v416_v18, %v1539_v10 }
 0x100   :  { %v136_v51 = vpop.f32.mrb[5].mxu0 }
 0x101   :  { %1207 = vmatprep.mubr.msk.f32.mxu1 %vm199_vm0, %v136_v51 }
 0x102   :  { %1208 = vmatmul.mubr.msk.f32.gmra.mrb[4].mxu1 %vm199_vm0, %v1177_v50 }
 0x103   :  { %v1180_v52 = vpop.f32.mrb[6].mxu0 }
 0x104   :  { %v146_v53 = vpop.f32.mrb[7].mxu0 }
 0x105   :  { %1210 = vmatprep.mubr.msk.f32.mxu1 %vm199_vm0, %v146_v53 }
 0x106   :  { %1211 = vmatmul.mubr.msk.f32.gmra.mrb[6].mxu1 %vm199_vm0, %v1180_v52 }
 0x107   :  { %v1183_v54 = vpop.f32.mrb[8].mxu0 }
 0x108   :  { %v156_v55 = vpop.f32.mrb[9].mxu0 }
 0x109   :  { %1213 = vmatprep.mubr.msk.f32.mxu1 %vm199_vm0, %v156_v55 }
 0x10a   :  { %1214 = vmatmul.mubr.msk.f32.gmra.mrb[8].mxu1 %vm199_vm0, %v1183_v54 }
 0x10b   :  { %v1186_v56 = vpop.f32.mrb[10].mxu0 }
 0x10c   :  { %v166_v57 = vpop.f32.mrb[11].mxu0 }
 0x10d   :  { %1216 = vmatprep.mubr.msk.f32.mxu1 %vm199_vm0, %v166_v57 }
 0x10e   :  { %1217 = vmatmul.mubr.msk.f32.gmra.mrb[10].mxu1 %vm199_vm0, %v1186_v56 }
 0x10f   :  { %v1189_v58 = vpop.f32.mrb[12].mxu0 }
 0x110   :  { %v176_v59 = vpop.f32.mrb[13].mxu0 }
 0x111   :  { %1219 = vmatprep.mubr.msk.f32.mxu1 %vm199_vm0, %v176_v59 }
 0x112   :  { %1220 = vmatmul.mubr.msk.f32.gmra.mrb[12].mxu1 %vm199_vm0, %v1189_v58 }
 0x113   :  { %v1192_v60 = vpop.f32.mrb[14].mxu0 }
 0x114   :  { %v186_v61 = vpop.f32.mrb[15].mxu0 }
 0x115   :  { %1222 = vmatprep.mubr.msk.f32.mxu1 %vm199_vm0, %v186_v61 }
 0x116   :  { %1223 = vmatmul.mubr.msk.f32.gmra.mrb[14].mxu1 %vm199_vm0, %v1192_v60  ;;  %vm1571_vm0 = vmpackc.low %vm449_vm9, %vm445_vm8  ;;  %vm464_vm8 = vcmp.eq.s32.totalorder %v415_v15, %v1535_v8 }
 0x117   :  { %731 = vmatprep.mubr.f32.mxu1 %v1370_v63  ;;  %1300 = vmatpush1.bf16.msk.msra.mxu0 %vm1571_vm0, %v1371_v13  ;;  %vm1588_vm9 = vmpackc.low %vm458_vm2, %vm454_vm1  ;;  %vm461_vm2 = vcmp.eq.s32.totalorder %v414_v14, %v1542_v12 }
 0x118   :  { %v1838_v20 = vsel %vm1588_vm9, 4294967295, %v1837_v20  ;;  %1302 = vmatprep.subr.msk.bf16.mxu0 %vm1588_vm9, %v1371_v13  ;;  %vm1273_vm1 = vmpackc.low %vm464_vm8, %vm460_vm7  ;;  %vm467_vm7 = vcmp.eq.s32.totalorder %v416_v18, %v1537_v9  ;;  %vm471_vm8 = vcmp.eq.s32.totalorder %v417_v19, %v1537_v9 }
 0x119   :  { %1274 = vmatprep.subr.msk.bf16.mxu1 %vm1273_vm1, %v1371_v13  ;;  %vm1614_vm9 = vmpackc.low %vm466_vm15, %vm462_vm14  ;;  %vm474_vm1 = vcmp.eq.s32.totalorder %v417_v19, %v1539_v10  ;;  %vm469_vm15 = vcmp.eq.s32.totalorder %v416_v18, %v1542_v12 }
 0x11a   :  { %1276 = vmatpush1.bf16.msk.msra.mxu1 %vm1275_vm6, %v1371_v13  ;;  %v1842_v24 = vsel %vm1614_vm9, 4294967295, %v1841_v24  ;;  %vm1623_vm10 = vmpackc.low %vm465_vm3, %vm461_vm2  ;;  %vm473_vm6 = vcmp.eq.s32.totalorder %v417_v19, %v1542_v12  ;;  %vm476_vm2 = vcmp.eq.s32.totalorder %v418_v22, %v1535_v8  ;;  %vm480_vm3 = vcmp.eq.s32.totalorder %v419_v23, %v1535_v8 }
 0x11b   :  { %1304 = vmatpush1.bf16.msk.msra.mxu0 %vm1597_vm12, %v1371_v13  ;;  %v1844_v25 = vsel %vm1623_vm10, 4294967295, %v1843_v25  ;;  %vm1277_vm14 = vmpackc.low %vm472_vm5, %vm468_vm4  ;;  %vm475_vm4 = vcmp.eq.s32.totalorder %v418_v22, %v1537_v9  ;;  %vm479_vm5 = vcmp.eq.s32.totalorder %v419_v23, %v1537_v9 }
 0x11c   :  { %1306 = vmatprep.subr.msk.bf16.mxu0 %vm1614_vm9, %v1371_v13  ;;  %1278 = vmatprep.subr.msk.bf16.mxu1 %vm1277_vm14, %v1371_v13  ;;  %vm1279_vm9 = vmpackc.low %vm471_vm8, %vm467_vm7  ;;  %vm478_vm8 = vcmp.eq.s32.totalorder %v418_v22, %v1539_v10  ;;  %vm481_vm14 = vcmp.eq.s32.totalorder %v419_v23, %v1542_v12 }
 0x11d   :  { %vm1640_vm12 = vmpackc.low %vm474_vm1, %vm470_vm11  ;;  %vm477_vm1 = vcmp.eq.s32.totalorder %v418_v22, %v1542_v12 }
 0x11e   :  { %1280 = vmatpush1.bf16.msk.msra.mxu1 %vm1279_vm9, %v1371_v13  ;;  %v1846_v28 = vsel %vm1640_vm12, 4294967295, %v1845_v28  ;;  %vm1649_vm7 = vmpackc.low %vm473_vm6, %vm469_vm15  ;;  %vm482_vm9 = vcmp.eq.s32.totalorder %v419_v23, %v1539_v10  ;;  %vm484_vm15 = vcmp.eq.s32.totalorder %v420_v26, %v1535_v8  ;;  %vm488_vm6 = vcmp.eq.s32.totalorder %v421_v27, %v1535_v8 }
 0x11f   :  { %1308 = vmatpush1.bf16.msk.msra.mxu0 %vm1623_vm10, %v1371_v13  ;;  %v1848_v29 = vsel %vm1649_vm7, 4294967295, %v1847_v29  ;;  %vm1281_vm11 = vmpackc.low %vm480_vm3, %vm476_vm2  ;;  %vm483_vm2 = vcmp.eq.s32.totalorder %v420_v26, %v1537_v9  ;;  %vm487_vm3 = vcmp.eq.s32.totalorder %v421_v27, %v1537_v9 }
 0x120   :  { %1310 = vmatprep.subr.msk.bf16.mxu0 %vm1640_vm12, %v1371_v13  ;;  %1282 = vmatprep.subr.msk.bf16.mxu1 %vm1281_vm11, %v1371_v13  ;;  %vm1283_vm12 = vmpackc.low %vm479_vm5, %vm475_vm4  ;;  %vm486_vm5 = vcmp.eq.s32.totalorder %v420_v26, %v1539_v10  ;;  %vm489_vm11 = vcmp.eq.s32.totalorder %v421_v27, %v1542_v12 }
 0x121   :  { %vm1666_vm10 = vmpackc.low %vm482_vm9, %vm478_vm8  ;;  %vm485_vm9 = vcmp.eq.s32.totalorder %v420_v26, %v1542_v12 }
 0x122   :  { %1284 = vmatpush1.bf16.msk.msra.mxu1 %vm1283_vm12, %v1371_v13  ;;  %v1850_v32 = vsel %vm1666_vm10, 4294967295, %v1849_v32  ;;  %vm1675_vm4 = vmpackc.low %vm481_vm14, %vm477_vm1  ;;  %vm490_vm12 = vcmp.eq.s32.totalorder %v421_v27, %v1539_v10  ;;  %vm492_vm1 = vcmp.eq.s32.totalorder %v422_v30, %v1535_v8  ;;  %vm496_vm14 = vcmp.eq.s32.totalorder %v423_v31, %v1535_v8 }
 0x123   :  { %1312 = vmatpush1.bf16.msk.msra.mxu0 %vm1649_vm7, %v1371_v13  ;;  %v1852_v33 = vsel %vm1675_vm4, 4294967295, %v1851_v33  ;;  %vm1285_vm8 = vmpackc.low %vm488_vm6, %vm484_vm15  ;;  %vm491_vm15 = vcmp.eq.s32.totalorder %v422_v30, %v1537_v9  ;;  %vm495_vm6 = vcmp.eq.s32.totalorder %v423_v31, %v1537_v9 }
 0x124   :  { %1314 = vmatprep.subr.msk.bf16.mxu0 %vm1666_vm10, %v1371_v13  ;;  %1286 = vmatprep.subr.msk.bf16.mxu1 %vm1285_vm8, %v1371_v13  ;;  %vm1287_vm10 = vmpackc.low %vm487_vm3, %vm483_vm2  ;;  %vm494_vm3 = vcmp.eq.s32.totalorder %v422_v30, %v1539_v10  ;;  %vm497_vm8 = vcmp.eq.s32.totalorder %v423_v31, %v1542_v12 }
 0x125   :  { %vm1692_vm7 = vmpackc.low %vm490_vm12, %vm486_vm5  ;;  %vm493_vm12 = vcmp.eq.s32.totalorder %v422_v30, %v1542_v12 }
 0x126   :  { %1288 = vmatpush1.bf16.msk.msra.mxu1 %vm1287_vm10, %v1371_v13  ;;  %v1854_v36 = vsel %vm1692_vm7, 4294967295, %v1853_v36  ;;  %vm1701_vm2 = vmpackc.low %vm489_vm11, %vm485_vm9  ;;  %vm498_vm10 = vcmp.eq.s32.totalorder %v423_v31, %v1539_v10  ;;  %vm500_vm9 = vcmp.eq.s32.totalorder %v424_v34, %v1535_v8  ;;  %vm504_vm11 = vcmp.eq.s32.totalorder %v425_v35, %v1535_v8 }
 0x127   :  { %1316 = vmatpush1.bf16.msk.msra.mxu0 %vm1675_vm4, %v1371_v13  ;;  %v1856_v37 = vsel %vm1701_vm2, 4294967295, %v1855_v37  ;;  %vm1289_vm5 = vmpackc.low %vm496_vm14, %vm492_vm1  ;;  %vm503_vm1 = vcmp.eq.s32.totalorder %v425_v35, %v1537_v9 }
 0x128   :  { %1318 = vmatprep.subr.msk.bf16.mxu0 %vm1692_vm7, %v1371_v13  ;;  %1290 = vmatprep.subr.msk.bf16.mxu1 %vm1289_vm5, %v1371_v13  ;;  %vm1291_vm7 = vmpackc.low %vm495_vm6, %vm491_vm15  ;;  %vm502_vm15 = vcmp.eq.s32.totalorder %v424_v34, %v1539_v10 }
 0x129   :  { %vm1716_vm4 = vmpackc.low %vm498_vm10, %vm494_vm3  ;;  %vm501_vm3 = vcmp.eq.s32.totalorder %v424_v34, %v1542_v12  ;;  %vm505_vm10 = vcmp.eq.s32.totalorder %v425_v35, %v1542_v12 }
 0x12a   :  { %1292 = vmatpush1.bf16.msk.msra.mxu1 %vm1291_vm7, %v1371_v13  ;;  %vm1725_vm14 = vmpackc.low %vm497_vm8, %vm493_vm12  ;;  %vm506_vm7 = vcmp.eq.s32.totalorder %v425_v35, %v1539_v10 }
 0x12b   :  { %1320 = vmatpush1.bf16.msk.msra.mxu0 %vm1701_vm2, %v1371_v13  ;;  %vm499_vm2 = vcmp.eq.s32.totalorder %v424_v34, %v1537_v9  ;;  %vm1293_vm6 = vmpackc.low %vm504_vm11, %vm500_vm9  ;;  %vm1868_vm9 = vnez %v1844_v25  ;;  %vm1869_vm11 = vnez %v1846_v28 }
 0x12c   :  { %1322 = vmatprep.subr.msk.bf16.mxu0 %vm1716_vm4, %v1371_v13  ;;  %1294 = vmatprep.subr.msk.bf16.mxu1 %vm1293_vm6, %v1371_v13  ;;  %vm1295_vm5 = vmpackc.low %vm503_vm1, %vm499_vm2  ;;  %vm1866_vm2 = vnez %v1840_v21  ;;  %vm1870_vm1 = vnez %v1848_v29  ;;  %vm1873_vm6 = vnez %v1854_v36 }
 0x12d   :  { %vm1738_vm12 = vmpackc.low %vm506_vm7, %vm502_vm15  ;;  %vm1871_vm15 = vnez %v1850_v32  ;;  %vm1872_vm7 = vnez %v1852_v33 }
 0x12e   :  { %1296 = vmatpush1.bf16.msk.msra.mxu1 %vm1295_vm5, %v1371_v13  ;;  %vm1745_vm8 = vmpackc.low %vm505_vm10, %vm501_vm3  ;;  %vm1874_vm3 = vnez %v1856_v37  ;;  %vm912_vm10 = vcmask 1040384  }
 0x12f   :  { %1324 = vmatpush1.bf16.msk.msra.mxu0 %vm1725_vm14, %v1371_v13  ;;  %1329 = vmatprep.subr.msk.bf16.mxu1 %vm1562_vm13, %v1371_v13  ;;  %vm1865_vm13 = vnez %v1838_v20 }
 0x130   :  { %1326 = vmatprep.subr.msk.bf16.mxu0 %vm1738_vm12, %v1371_v13 }
 0x133   :  { %1328 = vmatpush1.bf16.msk.msra.mxu0 %vm1745_vm8, %v1371_v13 }
 0x1cd   :  { %v1203_v42 = vpop.f32.mrb[0].mxu1 }
 0x1ce   :  { %v314_v43 = vpop.f32.mrb[1].mxu1  ;;  %v394_v47 = vmax.f32 %v1203_v42, 0.0 }
 0x1cf   :  { %v393_v44 = vmax.f32 %v314_v43, 0.0 }
 0x1d1   :  { %635 = vxpose.xlu0.b32.start [1/16] (narrow) %v393_v44, 32  ;;  %v1206_v45 = vpop.f32.mrb[2].mxu1 }
 0x1d2   :  { %v324_v46 = vpop.f32.mrb[3].mxu1  ;;  %v396_v53 = vmax.f32 %v1206_v45, 0.0 }
 0x1d3   :  { %v395_v50 = vmax.f32 %v324_v46, 0.0 }
 0x1d5   :  { %636 = vxpose.xlu0.b32.cont [2/16] (narrow) %v394_v47, 32  ;;  %v1209_v48 = vpop.f32.mrb[4].mxu1 }
 0x1d6   :  { %v334_v49 = vpop.f32.mrb[5].mxu1  ;;  %v398_v59 = vmax.f32 %v1209_v48, 0.0 }
 0x1d7   :  { %v397_v56 = vmax.f32 %v334_v49, 0.0 }
 0x1d9   :  { %637 = vxpose.xlu0.b32.cont [3/16] (narrow) %v395_v50, 32  ;;  %v1212_v51 = vpop.f32.mrb[6].mxu1 }
 0x1da   :  { %v344_v52 = vpop.f32.mrb[7].mxu1  ;;  %v400_v2 = vmax.f32 %v1212_v51, 0.0 }
 0x1db   :  { %v399_v62 = vmax.f32 %v344_v52, 0.0 }
 0x1dd   :  { %638 = vxpose.xlu0.b32.cont [4/16] (narrow) %v396_v53, 32  ;;  %v1215_v54 = vpop.f32.mrb[8].mxu1 }
 0x1de   :  { %v354_v55 = vpop.f32.mrb[9].mxu1  ;;  %v402_v4 = vmax.f32 %v1215_v54, 0.0 }
 0x1df   :  { %v401_v3 = vmax.f32 %v354_v55, 0.0 }
 0x1e1   :  { %639 = vxpose.xlu0.b32.cont [5/16] (narrow) %v397_v56, 32  ;;  %v1218_v57 = vpop.f32.mrb[10].mxu1 }
 0x1e2   :  { %v364_v58 = vpop.f32.mrb[11].mxu1  ;;  %v404_v6 = vmax.f32 %v1218_v57, 0.0 }
 0x1e3   :  { %v403_v5 = vmax.f32 %v364_v58, 0.0 }
 0x1e5   :  { %640 = vxpose.xlu0.b32.cont [6/16] (narrow) %v398_v59, 32  ;;  %v1221_v60 = vpop.f32.mrb[12].mxu1 }
 0x1e6   :  { %v374_v61 = vpop.f32.mrb[13].mxu1  ;;  %v406_v8 = vmax.f32 %v1221_v60, 0.0 }
 0x1e7   :  { %v405_v7 = vmax.f32 %v374_v61, 0.0 }
 0x1e9   :  { %641 = vxpose.xlu0.b32.cont [7/16] (narrow) %v399_v62, 32  ;;  %v1224_v0 = vpop.f32.mrb[14].mxu1 }
 0x1ea   :  { %v384_v1 = vpop.f32.mrb[15].mxu1  ;;  %v408_v10 = vmax.f32 %v1224_v0, 0.0 }
 0x1eb   :  { %v407_v9 = vmax.f32 %v384_v1, 0.0 }
 0x1ed   :  { %642 = vxpose.xlu0.b32.cont [8/16] (narrow) %v400_v2, 32 }
 0x1f1   :  { %643 = vxpose.xlu0.b32.cont [9/16] (narrow) %v401_v3, 32 }
 0x1f5   :  { %644 = vxpose.xlu0.b32.cont [10/16] (narrow) %v402_v4, 32 }
 0x1f9   :  { %645 = vxpose.xlu0.b32.cont [11/16] (narrow) %v403_v5, 32 }
 0x1fd   :  { %646 = vxpose.xlu0.b32.cont [12/16] (narrow) %v404_v6, 32 }
 0x201   :  { %647 = vxpose.xlu0.b32.cont [13/16] (narrow) %v405_v7, 32 }
 0x205   :  { %648 = vxpose.xlu0.b32.cont [14/16] (narrow) %v406_v8, 32 }
 0x209   :  { %649 = vxpose.xlu0.b32.cont [15/16] (narrow) %v407_v9, 32 }
 0x20d   :  { %650 = vxpose.xlu0.b32.end [16/16] (narrow) %v408_v10, 32 }
 0x251   :  { %v651_v11 = vpop.trf.xlu0 }
 0x252   :  { %732 = vmatmul.mubr.f32.vlgmr.msra.gmra.mrb[16].mxu1 %v651_v11  ;;  %821 = vmatmul.mubr.f32.vlgmr.msra.gmra.mrb[16].mxu0 %v651_v11 }
 0x253   :  { %1337 = vmatpush1.bf16.msk.msra.mxu1 %vm1571_vm0, %v1371_v13  ;;  %737 = vmatprep.mubr.f32.mxu1 %v1370_v63  ;;  %vm1867_vm0 = vnez %v1842_v24 }
 0x254   :  { %1330 = vmatprep.subr.msk.bf16.mxu1 %vm1865_vm13, %v1371_v13  ;;  %826 = vmatprep.mubr.f32.mxu0 %v1370_v63 }
 0x255   :  { %v652_v12 = vpop.trf.xlu0 }
 0x256   :  { %738 = vmatmul.mubr.f32.gmra.mrb[18].mxu1 %v652_v12  ;;  %827 = vmatmul.mubr.f32.gmra.mrb[18].mxu0 %v652_v12 }
 0x257   :  { %1338 = vmatpush1.bf16.msk.msra.mxu1 %vm1866_vm2, %v1371_v13  ;;  %743 = vmatprep.mubr.f32.mxu1 %v1370_v63 }
 0x258   :  { %1331 = vmatprep.subr.msk.bf16.mxu1 %vm1867_vm0, %v1371_v13  ;;  %832 = vmatprep.mubr.f32.mxu0 %v1370_v63 }
 0x259   :  { %v653_v14 = vpop.trf.xlu0 }
 0x25a   :  { %744 = vmatmul.mubr.f32.gmra.mrb[20].mxu1 %v653_v14  ;;  %833 = vmatmul.mubr.f32.gmra.mrb[20].mxu0 %v653_v14 }
 0x25b   :  { %1339 = vmatpush1.bf16.msk.msra.mxu1 %vm1868_vm9, %v1371_v13  ;;  %749 = vmatprep.mubr.f32.mxu1 %v1370_v63 }
 0x25c   :  { %1332 = vmatprep.subr.msk.bf16.mxu1 %vm1869_vm11, %v1371_v13 }
 0x25d   :  { %v654_v15 = vpop.trf.xlu0 }
 0x25e   :  { %750 = vmatmul.mubr.f32.gmra.mrb[22].mxu1 %v654_v15 }
 0x25f   :  { %1340 = vmatpush1.bf16.msk.msra.mxu1 %vm1870_vm1, %v1371_v13  ;;  %838 = vmatprep.mubr.f32.mxu1 %v1370_v63 }
 0x260   :  { %1333 = vmatprep.subr.msk.bf16.mxu1 %vm1871_vm15, %v1371_v13 }
 0x263   :  { %1341 = vmatpush1.bf16.msk.msra.mxu1 %vm1872_vm7, %v1371_v13 }
 0x264   :  { %1334 = vmatprep.subr.msk.bf16.mxu1 %vm1873_vm6, %v1371_v13 }
 0x267   :  { %1342 = vmatpush1.bf16.msk.msra.mxu1 %vm1874_vm3, %v1371_v13 }
 0x268   :  { %1335 = vmatprep.subr.msk.bf16.mxu1 %vm1716_vm4, %v1371_v13 }
 0x26b   :  { %1343 = vmatpush1.bf16.msk.msra.mxu1 %vm1725_vm14, %v1371_v13 }
 0x26c   :  { %1336 = vmatprep.subr.msk.bf16.mxu1 %vm1738_vm12, %v1371_v13 }
 0x26f   :  { %1344 = vmatpush1.bf16.msk.msra.mxu1 %vm1745_vm8, %v1371_v13 }
 0x272   :  { %839 = vmatmul.mubr.f32.vlgmr.msra.gmra.mrb[24].mxu1 %v654_v15 }
 0x325   :  { %v733_v63 = vpop.f32.mrb[16].mxu1  ;;  %v822_v16 = vpop.f32.mrb[16].mxu0 }
 0x326   :  { %v845_v17 = vmul.f32 %v822_v16, %v733_v63  ;;  %v735_v18 = vpop.f32.mrb[17].mxu1  ;;  %v824_v19 = vpop.f32.mrb[17].mxu0 }
 0x327   :  { %v846_v20 = vmul.f32 %v824_v19, %v735_v18 }
 0x329   :  { %v739_v21 = vpop.f32.mrb[18].mxu1  ;;  %v828_v22 = vpop.f32.mrb[18].mxu0 }
 0x32a   :  { %v847_v23 = vmul.f32 %v828_v22, %v739_v21  ;;  %v741_v24 = vpop.f32.mrb[19].mxu1  ;;  %v830_v25 = vpop.f32.mrb[19].mxu0 }
 0x32b   :  { %v848_v26 = vmul.f32 %v830_v25, %v741_v24 }
 0x32c   :  { %v853_v27 = vadd.f32 %v847_v23, %v845_v17 }
 0x32d   :  { %v862_v28 = vadd.f32 %v848_v26, %v846_v20  ;;  %v745_v29 = vpop.f32.mrb[20].mxu1  ;;  %v834_v30 = vpop.f32.mrb[20].mxu0 }
 0x32e   :  { %v849_v31 = vmul.f32 %v834_v30, %v745_v29  ;;  %v747_v32 = vpop.f32.mrb[21].mxu1  ;;  %v836_v13 = vpop.f32.mrb[21].mxu0 }
 0x32f   :  { %v850_v33 = vmul.f32 %v836_v13, %v747_v32 }
 0x330   :  { %v854_v34 = vadd.f32 %v853_v27, %v849_v31 }
 0x331   :  { %v863_v35 = vadd.f32 %v862_v28, %v850_v33  ;;  %v751_v36 = vpop.f32.mrb[22].mxu1 }
 0x332   :  { %v753_v37 = vpop.f32.mrb[23].mxu1 }
 0x345   :  { %v840_v38 = vpop.f32.mrb[24].mxu1 }
 0x346   :  { %v851_v39 = vmul.f32 %v840_v38, %v751_v36  ;;  %v842_v40 = vpop.f32.mrb[25].mxu1 }
 0x347   :  { %v852_v41 = vmul.f32 %v842_v40, %v753_v37 }
 0x348   :  { %v855_v42 = vadd.f32 %v854_v34, %v851_v39 }
 0x349   :  { %v864_v43 = vadd.f32 %v863_v35, %v852_v41 }
 0x34a   :  { %v856_v44 = vrot.slane %v855_v42, 4 }
 0x34b   :  { %v865_v45 = vrot.slane %v864_v43, 4 }
 0x34c   :  { %v857_v46 = vadd.f32 %v856_v44, %v855_v42 }
 0x34d   :  { %v866_v47 = vadd.f32 %v865_v45, %v864_v43 }
 0x34e   :  { %v858_v48 = vrot.slane %v857_v46, 2 }
 0x34f   :  { %v867_v49 = vrot.slane %v866_v47, 2 }
 0x350   :  { %v859_v50 = vadd.f32 %v858_v48, %v857_v46 }
 0x351   :  { %v868_v51 = vadd.f32 %v867_v49, %v866_v47 }
 0x352   :  { %v860_v52 = vrot.slane %v859_v50, 1 }
 0x353   :  { %v869_v53 = vrot.slane %v868_v51, 1 }
 0x354   :  { %v861_v54 = vadd.f32 %v860_v52, %v859_v50 }
 0x355   :  { %v870_v55 = vadd.f32 %v869_v53, %v868_v51 }
 0x356   :  { %v882_v56 = vand.u32 2147483647, %v861_v54  ;;  %v880_v14 = vmin.f32 %v861_v54, 0.0 }
 0x357   :  { %v879_v57 = vmul.f32 -1.0, %v870_v55 }
 0x358   :  { %v884_v58 = vsub.f32 0.0, %v882_v56 }
 0x359   :  { %v883_v59 = vand.u32 2147483647, %v879_v57  ;;  %v881_v19 = vmin.f32 %v879_v57, 0.0 }
 0x35a   :  { %v886_v60 = vmul.f32 1.442695, %v884_v58 }
 0x35b   :  { %v885_v61 = vsub.f32 0.0, %v883_v59 }
 0x35c   :  { %1350 = vpow2.f32 %v886_v60 }
 0x35d   :  { %v888_v62 = vmul.f32 1.442695, %v885_v61 }
 0x35f   :  { %1352 = vpow2.f32 %v888_v62 }
 0x366   :  { %v1351_v0 = vpop.eup %1350 }
 0x367   :  { %v890_v1 = vadd.f32 1.0, %v1351_v0  ;;  %v893_v4 = vmul.f32 -0.5, %v1351_v0  ;;  %v896_v7 = vand.u32 2147483647, %v1351_v0 }
 0x369   :  { %v1353_v2 = vpop.eup %1352  ;;  %1354 = vlog2.f32 %v890_v1  ;;  %v894_v6 = vadd.f32 1.0, %v893_v4  ;;  %vm897_vm4 = vcmp.lt.f32.partialorder %v896_v7, 0.0004427343 }
 0x36a   :  { %v899_v3 = vadd.f32 1.0, %v1353_v2  ;;  %v902_v5 = vmul.f32 -0.5, %v1353_v2  ;;  %v905_v12 = vand.u32 2147483647, %v1353_v2 }
 0x36b   :  { %v895_v11 = vmul.f32 %v1351_v0, %v894_v6 }
 0x36c   :  { %1356 = vlog2.f32 %v899_v3  ;;  %v903_v9 = vadd.f32 1.0, %v902_v5  ;;  %vm906_vm14 = vcmp.lt.f32.partialorder %v905_v12, 0.0004427343 }
 0x36e   :  { %v904_v17 = vmul.f32 %v1353_v2, %v903_v9 }
 0x373   :  { %v1355_v8 = vpop.eup %1354 }
 0x374   :  { %v892_v10 = vmul.f32 0.6931472, %v1355_v8 }
 0x376   :  { %v1357_v15 = vpop.eup %1356  ;;  %v898_v63 = vsel %vm897_vm4, %v895_v11, %v892_v10 }
 0x377   :  { %v901_v16 = vmul.f32 0.6931472, %v1357_v15  ;;  %v908_v18 = vsub.f32 %v880_v14, %v898_v63 }
 0x379   :  { %v907_v20 = vsel %vm906_vm14, %v904_v17, %v901_v16  ;;  %v910_v22 = vsub.f32 0.0, %v908_v18 }
 0x37a   :  { %v909_v21 = vsub.f32 %v881_v19, %v907_v20 }
 0x37b   :  { %v913_v24 = vsel %vm912_vm10, %v910_v22, 0.0 }
 0x37c   :  { %v911_v23 = vsub.f32 0.0, %v909_v21 }
 0x37e   :  { %v914_v25 = vsel %vm912_vm10, %v911_v23, 0.0 }
 0x37f   :  { %v915_v26 = vadd.f32 %v914_v25, %v913_v24 }
 0x381   :  { %916 = vadd.xlane.f32.xlu1 %v915_v26 }
 0x40e   :  { %v917_v27 = vpop.xlane.xlu1 %916 }
 0x40f   :  { %v918_v28 = vrot.slane %v917_v27, 4 }
 0x411   :  { %v919_v29 = vadd.f32 %v918_v28, %v917_v27 }
 0x413   :  { %v920_v30 = vrot.slane %v919_v29, 2 }
 0x415   :  { %v921_v31 = vadd.f32 %v920_v30, %v919_v29 }
 0x417   :  { %v922_v32 = vrot.slane %v921_v31, 1 }
 0x419   :  { %v923_v13 = vadd.f32 %v922_v32, %v921_v31 }
 0x41b   :  { %1345 = vpush %v923_v13 }
 0x44c   :  { %s1346_s3 = spop %1345 }
 0x44d   :  { %s925_s7 = smul.f32 0.0078125, %s1346_s3 }
 0x44f   :  { %927 = sst [smem:[#allocation2]] %s925_s7 }
 0x450   :  { %1367 = shalt.err (!%p1364_p2)
}
 0x451   :  { %s1372_s14 = smov [#allocation2]  }
 0x452   :  { %935 = dma.smem_to_hbm %s1372_s14, 16, %s1822_s4, [#allocation3]  }
 0x453   :  { %1368 = dma.done.wait [#allocation3], 16  }
 0x454   :  { %1369 = vsyncadd [#allocation3], 4294967280 }
 0x455   :  { %939 = sfence }
 0x456   :  { %940 = vsyncpa [#allocation3], 1 }

</bundles_post_ra>
